<compile_context>
chip_gen: v7x
topology: tpu7x:2x2x1
jax: 0.10.0
libtpu: 0.0.40
codegen_flags: <defaults>
</compile_context>

<pallas_src>
import jax
import jax.numpy as jnp
from jax.experimental import pallas as pl
from jax.experimental.pallas import tpu as pltpu


def _round_up(n: int, m: int) -> int:
    return (n + m - 1) // m * m


def _mlp_kernel(x_ref, w1_ref, b1_ref, w2_ref, b2_ref, o_ref):
    # fc1: (TB, D_in) @ (D_in, Hp) + (1, Hp)
    h = jnp.dot(x_ref[...], w1_ref[...], preferred_element_type=jnp.float32)
    h = jnp.maximum(h + b1_ref[...], 0.0)          # ReLU
    # fc2: (TB, Hp) @ (Hp, Dp) + (1, Dp)
    o = jnp.dot(h, w2_ref[...], preferred_element_type=jnp.float32)
    o = o + b2_ref[...]
    # Exact sigmoid in f32 (exp lowers to the EUP slot).
    o_ref[...] = (1.0 / (1.0 + jnp.exp(-o))).astype(o_ref.dtype)


def multilabel_forward(x, w1_t, b1, w2_t, b2, *, batch_tile=256):
    """sigmoid(relu(x @ w1_t + b1) @ w2_t + b2).

    x:    (B, D_in)  f32
    w1_t: (D_in, H)   (transpose of PyTorch fc1.weight)
    b1:   (H,)
    w2_t: (H, D_out)  (transpose of PyTorch fc2.weight)
    b2:   (D_out,)
    """
    B, D_in = x.shape
    H = w1_t.shape[1]
    D_out = w2_t.shape[1]

    # Lane-align the hidden and output feature dims to 128. Zero padding is
    # semantics-preserving: padded b1 columns ReLU to 0, padded w2 rows then
    # contribute 0 to the real output columns, and the padded output columns
    # are sliced off below.
    Hp = _round_up(H, 128)
    Dp = _round_up(D_out, 128)

    f32 = jnp.float32
    w1p = jnp.zeros((D_in, Hp), f32).at[:, :H].set(w1_t.astype(f32))
    b1p = jnp.zeros((1, Hp), f32).at[:, :H].set(b1.astype(f32))
    w2p = jnp.zeros((Hp, Dp), f32).at[:H, :D_out].set(w2_t.astype(f32))
    b2p = jnp.zeros((1, Dp), f32).at[:, :D_out].set(b2.astype(f32))

    if B <= batch_tile:
        # Single-shot kernel: no grid, no pipelining machinery. Everything
        # (few tens of KiB here) lives in VMEM for the whole call.
        vmem = pl.BlockSpec(memory_space=pltpu.MemorySpace.VMEM)
        out_p = pl.pallas_call(
            _mlp_kernel,
            out_shape=jax.ShapeDtypeStruct((B, Dp), f32),
            in_specs=[vmem, vmem, vmem, vmem, vmem],
            out_specs=vmem,
        )(x.astype(f32), w1p, b1p, w2p, b2p)
        return out_p[:, :D_out]

    # Large batch: tile the batch dimension. Weights/biases use a constant
    # index_map so they stay VMEM-resident across grid steps; the batch axis
    # is independent work -> "parallel" (lets v7x shard steps over its 2 TCs).
    TB = _round_up(batch_tile, 8)          # f32 sublane alignment
    Bp = _round_up(B, TB)
    xp = x.astype(f32)
    if Bp != B:
        xp = jnp.zeros((Bp, D_in), f32).at[:B].set(xp)

    out_p = pl.pallas_call(
        _mlp_kernel,
        out_shape=jax.ShapeDtypeStruct((Bp, Dp), f32),
        grid=(Bp // TB,),
        in_specs=[
            pl.BlockSpec((TB, D_in), lambda i: (i, 0)),
            pl.BlockSpec((D_in, Hp), lambda i: (0, 0)),
            pl.BlockSpec((1, Hp), lambda i: (0, 0)),
            pl.BlockSpec((Hp, Dp), lambda i: (0, 0)),
            pl.BlockSpec((1, Dp), lambda i: (0, 0)),
        ],
        out_specs=pl.BlockSpec((TB, Dp), lambda i: (i, 0)),
        compiler_params=pltpu.CompilerParams(
            dimension_semantics=("parallel",),
        ),
    )(xp, w1p, b1p, w2p, b2p)
    return out_p[:B, :D_out]


def _reference_forward(x, w1_t, b1, w2_t, b2):
    h = jnp.maximum(x @ w1_t + b1, 0.0)
    return jax.nn.sigmoid(h @ w2_t + b2)


if __name__ == "__main__":
    # Shapes consistent with the module: input_dim=32, hidden_dim=100,
    # output_dim=8 multilabel targets, batch=8.
    batch, input_dim, hidden_dim, output_dim = 8, 32, 100, 8

    key = jax.random.PRNGKey(0)
    k_x, k_w1, k_b1, k_w2, k_b2, k_x2 = jax.random.split(key, 6)

    x = jax.random.normal(k_x, (batch, input_dim), dtype=jnp.float32)

    # Deterministic init mimicking nn.Linear's uniform(-1/sqrt(fan_in), +1/sqrt(fan_in)),
    # stored directly in (in, out) layout (= transpose of PyTorch's (out, in)).
    bound1 = 1.0 / (input_dim ** 0.5)
    bound2 = 1.0 / (hidden_dim ** 0.5)
    w1_t = jax.random.uniform(k_w1, (input_dim, hidden_dim), jnp.float32,
                              minval=-bound1, maxval=bound1)
    b1 = jax.random.uniform(k_b1, (hidden_dim,), jnp.float32,
                            minval=-bound1, maxval=bound1)
    w2_t = jax.random.uniform(k_w2, (hidden_dim, output_dim), jnp.float32,
                              minval=-bound2, maxval=bound2)
    b2 = jax.random.uniform(k_b2, (output_dim,), jnp.float32,
                            minval=-bound2, maxval=bound2)

    # Small-batch (single-shot, no-grid) path.
    out = jax.block_until_ready(multilabel_forward(x, w1_t, b1, w2_t, b2))
    ref = _reference_forward(x, w1_t, b1, w2_t, b2)
    assert out.shape == (batch, output_dim)
    assert jnp.allclose(out, ref, atol=1e-5, rtol=1e-5)

    # Also exercise the batch-tiled (grid) path with a non-multiple batch.
    x_big = jax.random.normal(k_x2, (40, input_dim), dtype=jnp.float32)
    out_big = jax.block_until_ready(
        multilabel_forward(x_big, w1_t, b1, w2_t, b2, batch_tile=16))
    ref_big = _reference_forward(x_big, w1_t, b1, w2_t, b2)
    assert out_big.shape == (40, output_dim)
    assert jnp.allclose(out_big, ref_big, atol=1e-5, rtol=1e-5)

    print("KERNEL_OK")
</pallas_src>

<mosaic_0001>
module attributes {stable_mosaic.version = 11 : i64} {
  func.func @_mlp_kernel(%arg0: memref<8x32xf32, #tpu.memory_space<vmem>>, %arg1: memref<32x128xf32, #tpu.memory_space<vmem>>, %arg2: memref<1x128xf32, #tpu.memory_space<vmem>>, %arg3: memref<128x128xf32, #tpu.memory_space<vmem>>, %arg4: memref<1x128xf32, #tpu.memory_space<vmem>>, %arg5: memref<8x128xf32, #tpu.memory_space<vmem>>) attributes {dimension_semantics = [], scalar_prefetch = 0 : i64, scratch_operands = 0 : i64, tpu.core_type = #tpu.core_type<tc>} {
    %c0 = arith.constant 0 : index
    %c0_0 = arith.constant 0 : index
    %0 = vector.load %arg0[%c0, %c0_0] : memref<8x32xf32, #tpu.memory_space<vmem>>, vector<8x32xf32>
    %c0_1 = arith.constant 0 : index
    %c0_2 = arith.constant 0 : index
    %1 = vector.load %arg1[%c0_1, %c0_2] : memref<32x128xf32, #tpu.memory_space<vmem>>, vector<32x128xf32>
    %cst = arith.constant dense<0.000000e+00> : vector<8x128xf32>
    %2 = tpu.matmul %0, %1, %cst {dimension_numbers = #tpu.dot_dimension_numbers<[1], [0], [0], [1], [0, 0, 1, 1], [], []>} : vector<8x32xf32>, vector<32x128xf32>, vector<8x128xf32> -> vector<8x128xf32>
    %c0_3 = arith.constant 0 : index
    %c0_4 = arith.constant 0 : index
    %3 = vector.load %arg2[%c0_3, %c0_4] : memref<1x128xf32, #tpu.memory_space<vmem>>, vector<1x128xf32>
    %4 = vector.broadcast %3 : vector<1x128xf32> to vector<8x128xf32>
    %5 = arith.addf %2, %4 : vector<8x128xf32>
    %cst_5 = arith.constant 0.000000e+00 : f32
    %6 = vector.broadcast %cst_5 : f32 to vector<8x128xf32>
    %7 = arith.maximumf %5, %6 : vector<8x128xf32>
    %c0_6 = arith.constant 0 : index
    %c0_7 = arith.constant 0 : index
    %8 = vector.load %arg3[%c0_6, %c0_7] : memref<128x128xf32, #tpu.memory_space<vmem>>, vector<128x128xf32>
    %cst_8 = arith.constant dense<0.000000e+00> : vector<8x128xf32>
    %9 = tpu.matmul %7, %8, %cst_8 {dimension_numbers = #tpu.dot_dimension_numbers<[1], [0], [0], [1], [0, 0, 1, 1], [], []>} : vector<8x128xf32>, vector<128x128xf32>, vector<8x128xf32> -> vector<8x128xf32>
    %c0_9 = arith.constant 0 : index
    %c0_10 = arith.constant 0 : index
    %10 = vector.load %arg4[%c0_9, %c0_10] : memref<1x128xf32, #tpu.memory_space<vmem>>, vector<1x128xf32>
    %11 = vector.broadcast %10 : vector<1x128xf32> to vector<8x128xf32>
    %12 = arith.addf %9, %11 : vector<8x128xf32>
    %cst_11 = arith.constant 0.000000e+00 : f32
    %13 = vector.broadcast %cst_11 : f32 to vector<8x128xf32>
    %14 = arith.subf %13, %12 : vector<8x128xf32>
    %15 = math.exp %14 : vector<8x128xf32>
    %cst_12 = arith.constant 1.000000e+00 : f32
    %16 = vector.broadcast %cst_12 : f32 to vector<8x128xf32>
    %17 = arith.addf %16, %15 : vector<8x128xf32>
    %cst_13 = arith.constant 1.000000e+00 : f32
    %18 = vector.broadcast %cst_13 : f32 to vector<8x128xf32>
    %19 = arith.divf %18, %17 : vector<8x128xf32>
    %c0_14 = arith.constant 0 : index
    %c0_15 = arith.constant 0 : index
    %20 = vector.load %arg5[%c0_14, %c0_15] : memref<8x128xf32, #tpu.memory_space<vmem>>, vector<8x128xf32>
    tpu.vector_store %arg5[%c0_14, %c0_15], %19 {strides = array<i32>} : memref<8x128xf32, #tpu.memory_space<vmem>>, vector<8x128xf32>,
    return
  }
}

</mosaic_0001>

<bundles_post_ra>
// kernel: tpu_custom_call.1
= control target key start
LH: loop header
LB: loop body
LE: loop exit
PB: predicated region body
PF: predicated region fallthrough
CT: control target
= control target key end

     0   :  { %10 = vsyncpa [#allocation3], 0  ;;  %s570_s0 = inlined_call_operand.hbm [shape: f32[8,32], index: 0, kind: input, shape index: {}]   ;;  %s571_s1 = inlined_call_operand.hbm [shape: f32[32,128], index: 1, kind: input, shape index: {}]   ;;  %s572_s2 = inlined_call_operand.vmem [shape: f32[1,128], index: 2, kind: input, shape index: {}]   ;;  %s573_s3 = inlined_call_operand.hbm [shape: f32[128,128], index: 3, kind: input, shape index: {}]   ;;  %s574_s4 = inlined_call_operand.vmem [shape: f32[1,128], index: 4, kind: input, shape index: {}]   ;;  %s575_s5 = inlined_call_operand.hbm [shape: f32[8,128], index: 5, kind: output, shape index: {}]  }
   0x1   :  { %11 = vsyncpa [#allocation6], 0 }
   0x2   :  { %12 = vsyncpa [#allocation4], 0  ;;  %s471_s18 = smov [#allocation5]   ;;  %s377_s22 = scalar_lea.hbm %s571_s1, 512 }
   0x3   :  { %s28_s19 = sshll.u32 %s471_s18, 4  ;;  %p378_p0 = scmp.ne.s32.totalorder %s571_s1, %s377_s22  ;;  %s29_s19 = int_to_ptr.vmem [resolvable:$true] %s28_s19 }
   0x4   :  { %p381_p1 = scmp.lt.u32.totalorder %s377_s22, %s571_s1 }
   0x6   :  { %p383_p2 = pnand %p381_p1, %p378_p0 }
   0x8   :  { %386 = shalt.err (!%p383_p2)
}
   0x9   :  { %s387_s27 = scalar_lea.vmem %s29_s19, 512  ;;  %p392_p4 = scmp.lt.s32.totalorder %s29_s19, %s29_s19 }
   0xa   :  { %p388_p3 = scmp.ne.s32.totalorder %s29_s19, %s387_s27  ;;  %p393_p5 = scmp.lt.s32.totalorder %s387_s27, %s387_s27 }
   0xc   :  { %p394_p6 = por %p393_p5, %p392_p4 }
   0xe   :  { %p395_p7 = pnand %p394_p6, %p388_p3 }
  0x10   :  { %398 = shalt.err (!%p395_p7)
}
  0x11   :  { %s472_s28 = smov 128   ;;  %s473_s29 = smov 8  }
  0x12   :  { %34 = dma.hbm_to_vmem [thread:$0]  %s571_s1, 512, %s29_s19, [#allocation6], %s472_s28, %s472_s28, %s473_s29  }
  0x13   :  { %s474_s7 = smov [#allocation2]   ;;  %s475_s9 = smov [#allocation7]  }
  0x14   :  { %s19_s8 = sshll.u32 %s474_s7, 4  ;;  %s42_s10 = sshll.u32 %s475_s9, 4  ;;  %s20_s8 = int_to_ptr.vmem [resolvable:$true] %s19_s8  ;;  %s43_s10 = int_to_ptr.vmem [resolvable:$true] %s42_s10 }
  0x15   :  { %s399_s13 = scalar_lea.hbm %s570_s0, 128 }
  0x16   :  { %p400_p8 = scmp.ne.s32.totalorder %s570_s0, %s399_s13  ;;  %p403_p9 = scmp.lt.u32.totalorder %s399_s13, %s570_s0 }
  0x18   :  { %p405_p10 = pnand %p403_p9, %p400_p8 }
  0x1a   :  { %408 = shalt.err (!%p405_p10)
}
  0x1b   :  { %s409_s1 = scalar_lea.vmem %s20_s8, 128  ;;  %p414_p12 = scmp.lt.s32.totalorder %s20_s8, %s20_s8 }
  0x1c   :  { %p410_p11 = scmp.ne.s32.totalorder %s20_s8, %s409_s1  ;;  %p415_p13 = scmp.lt.s32.totalorder %s409_s1, %s409_s1 }
  0x1e   :  { %p416_p0 = por %p415_p13, %p414_p12 }
  0x20   :  { %p417_p1 = pnand %p416_p0, %p410_p11 }
  0x22   :  { %420 = shalt.err (!%p417_p1)
}
  0x23   :  { %22 = dma.hbm_to_vmem [thread:$0]  %s570_s0, 128, %s20_s8, [#allocation3]  }
  0x24   :  { %s421_s22 = scalar_lea.hbm %s573_s3, 2048 }
  0x25   :  { %p422_p2 = scmp.ne.s32.totalorder %s573_s3, %s421_s22  ;;  %p425_p3 = scmp.lt.u32.totalorder %s421_s22, %s573_s3 }
  0x27   :  { %p427_p4 = pnand %p425_p3, %p422_p2 }
  0x29   :  { %430 = shalt.err (!%p427_p4)
}
  0x2a   :  { %s431_s27 = scalar_lea.vmem %s43_s10, 2048  ;;  %p436_p6 = scmp.lt.s32.totalorder %s43_s10, %s43_s10 }
  0x2b   :  { %p432_p5 = scmp.ne.s32.totalorder %s43_s10, %s431_s27  ;;  %p437_p7 = scmp.lt.s32.totalorder %s431_s27, %s431_s27 }
  0x2d   :  { %p438_p8 = por %p437_p7, %p436_p6 }
  0x2f   :  { %p439_p9 = pnand %p438_p8, %p432_p5 }
  0x31   :  { %442 = shalt.err (!%p439_p9)
}
  0x32   :  { %48 = dma.hbm_to_vmem [thread:$0]  %s573_s3, 2048, %s43_s10, [#allocation6], %s472_s28, %s472_s28, %s473_s29  }
  0x33   :  { %465 = dma.done.wait [#allocation3], 128  }
  0x34   :  { %466 = vsyncadd [#allocation3], 4294967168 }
  0x35   :  { %467 = dma.done.wait [#allocation6], 2560  }
  0x36   :  { %468 = vsyncadd [#allocation6], 4294964736  ;;  %v476_v0 = vmov 0.0|0.0   ;;  %vm477_vm0 = vmmov 0   ;;  %v478_v1 = vmov 0.0   ;;  %v61_v2 = vld [vmem:[#allocation5] sm:$0xff] }
  0x37   :  { %334 = vmatprep.subr.bf16.mxu0 %v476_v0  ;;  %296 = vmatprep.mubr.msk.f32.mxu0 %vm477_vm0, %v478_v1  ;;  %v62_v3 = vld [vmem:[#allocation5 + $0x8] sm:$0xff]  ;;  %v63_v4 = vld [vmem:[#allocation5 + $0x10] sm:$0xff]  ;;  %v64_v6 = vld [vmem:[#allocation5 + $0x18] sm:$0xff]  ;;  %vm72_vm1 = vcmask 261120   ;;  %s479_s7 = smov [#allocation8]  }
  0x38   :  { %340 = vmatprep.subr.bf16.mxu1 %v476_v0  ;;  %331 = vmatprep.mubr.msk.f32.mxu1 %vm477_vm0, %v478_v1  ;;  %v335_v5 = vpack.c.bf16 %v62_v3, %v61_v2  ;;  %v147_v7 = vld [vmem:[#allocation7] sm:$0xff]  ;;  %v148_v8 = vld [vmem:[#allocation7 + $0x8] sm:$0xff]  ;;  %v149_v9 = vld [vmem:[#allocation7 + $0x10] sm:$0xff]  ;;  %v338_v11 = vpack.c.bf16 %v64_v6, %v63_v4 }
  0x39   :  { %v150_v10 = vld [vmem:[#allocation7 + $0x18] sm:$0xff]  ;;  %v341_v12 = vpack.c.bf16 %v148_v8, %v147_v7  ;;  %v151_v14 = vld [vmem:[#allocation7 + $0x20] sm:$0xff]  ;;  %v152_v15 = vld [vmem:[#allocation7 + $0x28] sm:$0xff] }
  0x3a   :  { %336 = vmatpush3.bf16.msra.mxu0 %v335_v5  ;;  %v344_v13 = vpack.c.bf16 %v150_v10, %v149_v9  ;;  %v60_v16 = vld [vmem:[#allocation2] sm:$0xff]  ;;  %v347_v17 = vpack.c.bf16 %v152_v15, %v151_v14  ;;  %v153_v18 = vld [vmem:[#allocation7 + $0x30] sm:$0xff]  ;;  %v155_v21 = vld [vmem:[#allocation7 + $0x40] sm:$0xff] }
  0x3b   :  { %337 = vmatprep.subr.bf16.mxu0 %v476_v0  ;;  %342 = vmatpush3.bf16.msra.mxu1 %v341_v12  ;;  %v154_v19 = vld [vmem:[#allocation7 + $0x38] sm:$0xff]  ;;  %v156_v22 = vld [vmem:[#allocation7 + $0x48] sm:$0xff]  ;;  %v157_v24 = vld [vmem:[#allocation7 + $0x50] sm:$0xff] }
  0x3c   :  { %343 = vmatprep.subr.bf16.mxu1 %v476_v0  ;;  %v350_v20 = vpack.c.bf16 %v154_v19, %v153_v18  ;;  %v353_v23 = vpack.c.bf16 %v156_v22, %v155_v21  ;;  %v158_v25 = vld [vmem:[#allocation7 + $0x58] sm:$0xff]  ;;  %v159_v27 = vld [vmem:[#allocation7 + $0x60] sm:$0xff]  ;;  %v160_v28 = vld [vmem:[#allocation7 + $0x68] sm:$0xff] }
  0x3d   :  { %v356_v26 = vpack.c.bf16 %v158_v25, %v157_v24  ;;  %v359_v29 = vpack.c.bf16 %v160_v28, %v159_v27  ;;  %v161_v30 = vld [vmem:[#allocation7 + $0x70] sm:$0xff]  ;;  %v162_v31 = vld [vmem:[#allocation7 + $0x78] sm:$0xff] }
  0x3e   :  { %339 = vmatpush3.bf16.msra.mxu0 %v338_v11  ;;  %v362_v32 = vpack.c.bf16 %v162_v31, %v161_v30  ;;  %v263_v33 = vld [vmem:[%s572_s2] ss:$0 sm:$0xff]  ;;  %s253_s2 = sshll.u32 %s479_s7, 4  ;;  %s254_s2 = int_to_ptr.vmem [resolvable:$true] %s253_s2 }
  0x3f   :  { %345 = vmatpush3.bf16.msra.mxu1 %v344_v13  ;;  %v265_v38 = vld [vmem:[%s574_s4] ss:$0 sm:$0xff]  ;;  %s443_s8 = scalar_lea.vmem %s254_s2, 128  ;;  %p448_p11 = scmp.lt.s32.totalorder %s254_s2, %s254_s2 }
  0x40   :  { %346 = vmatprep.subr.bf16.mxu1 %v476_v0  ;;  %p444_p10 = scmp.ne.s32.totalorder %s254_s2, %s443_s8  ;;  %p449_p12 = scmp.lt.s32.totalorder %s443_s8, %s443_s8 }
  0x41   :  { %297 = vmatmul.mubr.msk.f32.vlgmr.msra.gmra.mrb[0].mxu0 %vm72_vm1, %v60_v16 }
  0x42   :  { %p450_p13 = por %p449_p12, %p448_p11 }
  0x43   :  { %348 = vmatpush3.bf16.msra.mxu1 %v347_v17 }
  0x44   :  { %349 = vmatprep.subr.bf16.mxu1 %v476_v0  ;;  %p451_p0 = pnand %p450_p13, %p444_p10 }
  0x47   :  { %351 = vmatpush3.bf16.msra.mxu1 %v350_v20 }
  0x48   :  { %352 = vmatprep.subr.bf16.mxu1 %v476_v0 }
  0x4b   :  { %354 = vmatpush3.bf16.msra.mxu1 %v353_v23 }
  0x4c   :  { %355 = vmatprep.subr.bf16.mxu1 %v476_v0 }
  0x4f   :  { %357 = vmatpush3.bf16.msra.mxu1 %v356_v26 }
  0x50   :  { %358 = vmatprep.subr.bf16.mxu1 %v476_v0 }
  0x53   :  { %360 = vmatpush3.bf16.msra.mxu1 %v359_v29 }
  0x54   :  { %361 = vmatprep.subr.bf16.mxu1 %v476_v0 }
  0x57   :  { %363 = vmatpush3.bf16.msra.mxu1 %v362_v32 }
 0x114   :  { %v142_v34 = vpop.f32.mrb[0].mxu0 }
 0x115   :  { %v143_v35 = vadd.f32 %v263_v33, %v142_v34  ;;  %v298_v36 = vpop.f32.mrb[1].mxu0 }
 0x117   :  { %v146_v37 = vmax.f32 %v143_v35, 0.0 }
 0x119   :  { %332 = vmatmul.mubr.f32.vlgmr.msra.gmra.mrb[0].mxu1 %v146_v37 }
 0x1ec   :  { %v236_v39 = vpop.f32.mrb[0].mxu1 }
 0x1ed   :  { %v237_v40 = vadd.f32 %v265_v38, %v236_v39  ;;  %v333_v41 = vpop.f32.mrb[1].mxu1 }
 0x1ef   :  { %v240_v42 = vsub.f32 0.0, %v237_v40 }
 0x1f1   :  { %v241_v43 = vmul.f32 1.442695, %v240_v42 }
 0x1f3   :  { %373 = vpow2.f32 %v241_v43 }
 0x1fd   :  { %v374_v44 = vpop.eup %373 }
 0x1fe   :  { %v243_v45 = vadd.f32 1.0, %v374_v44 }
 0x200   :  { %375 = vrcp.f32 %v243_v45 }
 0x20a   :  { %v376_v46 = vpop.eup %375 }
 0x20b   :  { %246 = vst [vmem:[#allocation8] sm:$0xff] %v376_v46 }
 0x20c   :  { %454 = shalt.err (!%p451_p0)
}
 0x20d   :  { %s455_s10 = scalar_lea.hbm %s575_s5, 128 }
 0x20e   :  { %p456_p1 = scmp.ne.s32.totalorder %s575_s5, %s455_s10  ;;  %p459_p2 = scmp.lt.u32.totalorder %s455_s10, %s575_s5 }
 0x210   :  { %p461_p3 = pnand %p459_p2, %p456_p1 }
 0x212   :  { %464 = shalt.err (!%p461_p3)
}
 0x213   :  { %256 = dma.vmem_to_hbm [thread:$0]  %s254_s2, 128, %s575_s5, [#allocation4]  }
 0x214   :  { %469 = dma.done.wait [#allocation4], 128  }
 0x215   :  { %470 = vsyncadd [#allocation4], 4294967168 }
 0x216   :  { %260 = vsyncpa [#allocation3], 1 }
 0x217   :  { %261 = vsyncpa [#allocation6], 1 }
 0x218   :  { %262 = vsyncpa [#allocation4], 1 }

</bundles_post_ra>
